<compile_context>
chip_gen: v6e
topology: v6e:2x2x1
jax: 0.10.0
libtpu: 0.0.40
codegen_flags: <defaults>
</compile_context>

<pallas_src>
import jax
import jax.numpy as jnp
from jax.experimental import pallas as pl
from jax.experimental.pallas import tpu as pltpu


def _double_conv_kernel(x_ref, w1_ref, s1_ref, b1_ref, w2_ref, s2_ref, b2_ref,
                        o_ref, xpad_ref, hpad_ref):
    """One grid step = one batch element. Lane-dense (H, W*C) activation layout.

    x_ref:    (1, H, W*Cin)           input image, channels folded into lanes
    w1_ref:   (3, W*Cin,  W*Cmid)     banded conv matrices, one per kernel row kh
    s1_ref:   (1, W*Cmid)             folded BN scale (lane-tiled)
    b1_ref:   (1, W*Cmid)             folded BN bias incl. conv bias (lane-tiled)
    w2_ref:   (3, W*Cmid, W*Cout)
    s2_ref:   (1, W*Cout)
    b2_ref:   (1, W*Cout)
    o_ref:    (1, H, W*Cout)
    xpad_ref: (H+2, W*Cin)   VMEM: input with one zero halo row above/below
    hpad_ref: (H+2, W*Cmid)  VMEM: conv1 output with zero halo rows (never in HBM)
    """
    H = o_ref.shape[1]

    def conv3x3(src_ref, wband_ref):
        # Sum over the 3 kernel rows; each is one MXU matmul whose banded RHS
        # carries the 3 horizontal taps (left/right zero padding is dropped
        # inside the band, so no horizontal halo columns are needed).
        acc = jnp.dot(src_ref[0:H, :], wband_ref[0],
                      preferred_element_type=jnp.float32)
        acc += jnp.dot(src_ref[1:H + 1, :], wband_ref[1],
                       preferred_element_type=jnp.float32)
        acc += jnp.dot(src_ref[2:H + 2, :], wband_ref[2],
                       preferred_element_type=jnp.float32)
        return acc

    # ---- stage 1: conv -> (Dropout2d: identity in eval) -> BN -> ReLU ----
    xpad_ref[0:1, :] = jnp.zeros((1, xpad_ref.shape[1]), xpad_ref.dtype)
    xpad_ref[H + 1:H + 2, :] = jnp.zeros((1, xpad_ref.shape[1]), xpad_ref.dtype)
    xpad_ref[1:H + 1, :] = x_ref[0].astype(xpad_ref.dtype)

    h1 = conv3x3(xpad_ref, w1_ref)
    h1 = jnp.maximum(h1 * s1_ref[...] + b1_ref[...], 0.0)

    # ---- stage 2 feeds from VMEM scratch: intermediate never touches HBM ----
    hpad_ref[0:1, :] = jnp.zeros((1, hpad_ref.shape[1]), hpad_ref.dtype)
    hpad_ref[H + 1:H + 2, :] = jnp.zeros((1, hpad_ref.shape[1]), hpad_ref.dtype)
    hpad_ref[1:H + 1, :] = h1

    h2 = conv3x3(hpad_ref, w2_ref)
    h2 = jnp.maximum(h2 * s2_ref[...] + b2_ref[...], 0.0)
    o_ref[0] = h2.astype(o_ref.dtype)


def _band_conv_matrix(w_hwio, width):
    """(3, 3, Cin, Cout) HWIO weights -> (3, W*Cin, W*Cout) banded matrices.

    big[kh, a*Cin + ci, w*Cout + co] = w_hwio[kh, kw, ci, co] where a = w + kw - 1;
    taps that would read the horizontal zero padding are omitted (contribution 0).
    Then the 3x3 conv on a lane-folded row block X (rows = padded H, lanes = W*Cin)
    is:  out = sum_kh X[kh:kh+H, :] @ big[kh].
    """
    kh_, kw_, cin, cout = w_hwio.shape
    # sel[kw, a, w] = 1 iff a == w + kw - 1
    sel = jnp.stack([jnp.eye(width, k=1 - kw, dtype=w_hwio.dtype)
                     for kw in range(kw_)])
    big = jnp.einsum("kaw,hkio->haiwo", sel, w_hwio)      # (3, W, Cin, W, Cout)
    return big.reshape(kh_, width * cin, width * cout)


def fold_bn(conv_bias, gamma, beta, running_mean, running_var, eps=1e-5):
    """Fold eval-mode BatchNorm (+ conv bias) into per-channel scale/bias."""
    scale = gamma / jnp.sqrt(running_var + eps)
    bias = beta + scale * (conv_bias - running_mean)
    return scale, bias


def _fused_double_conv(x_flat, w1b, s1t, b1t, w2b, s2t, b2t, H, W, cin, cmid, cout):
    N = x_flat.shape[0]
    return pl.pallas_call(
        _double_conv_kernel,
        out_shape=jax.ShapeDtypeStruct((N, H, W * cout), x_flat.dtype),
        grid=(N,),
        in_specs=[
            pl.BlockSpec((1, H, W * cin), lambda n: (n, 0, 0)),
            pl.BlockSpec((3, W * cin, W * cmid), lambda n: (0, 0, 0)),
            pl.BlockSpec((1, W * cmid), lambda n: (0, 0)),
            pl.BlockSpec((1, W * cmid), lambda n: (0, 0)),
            pl.BlockSpec((3, W * cmid, W * cout), lambda n: (0, 0, 0)),
            pl.BlockSpec((1, W * cout), lambda n: (0, 0)),
            pl.BlockSpec((1, W * cout), lambda n: (0, 0)),
        ],
        out_specs=pl.BlockSpec((1, H, W * cout), lambda n: (n, 0, 0)),
        scratch_shapes=[
            pltpu.VMEM((H + 2, W * cin), jnp.float32),
            pltpu.VMEM((H + 2, W * cmid), jnp.float32),
        ],
        compiler_params=pltpu.CompilerParams(
            dimension_semantics=("parallel",)),   # batch is independent -> both TCs on v7x
    )(x_flat, w1b, s1t, b1t, w2b, s2t, b2t)


@jax.jit
def double_conv_dropout(x_nchw, params):
    N, cin, H, W = x_nchw.shape
    cmid = params["w1"].shape[-1]
    cout = params["w2"].shape[-1]

    # NCHW -> (N, H, W*Cin): channels folded into the lane axis (lane-dense I/O).
    # TODO(synk): in a full UNet keep activations in this layout end-to-end instead
    #             of converting around every block.
    x = jnp.transpose(x_nchw, (0, 2, 3, 1)).reshape(N, H, W * cin)

    s1, b1 = fold_bn(params["b1"], params["gamma1"], params["beta1"],
                     params["mean1"], params["var1"])
    s2, b2 = fold_bn(params["b2"], params["gamma2"], params["beta2"],
                     params["mean2"], params["var2"])

    w1b = _band_conv_matrix(params["w1"], W)
    w2b = _band_conv_matrix(params["w2"], W)
    s1t = jnp.tile(s1, W).reshape(1, W * cmid)
    b1t = jnp.tile(b1, W).reshape(1, W * cmid)
    s2t = jnp.tile(s2, W).reshape(1, W * cout)
    b2t = jnp.tile(b2, W).reshape(1, W * cout)

    y = _fused_double_conv(x, w1b, s1t, b1t, w2b, s2t, b2t, H, W, cin, cmid, cout)

    # (N, H, W*Cout) -> NCHW to match the PyTorch output convention.
    return jnp.transpose(y.reshape(N, H, W, cout), (0, 3, 1, 2))


# ----------------------------- pure-JAX reference -----------------------------

def _ref_block(x_nhwc, w_hwio, scale, bias):
    y = jax.lax.conv_general_dilated(
        x_nhwc, w_hwio, window_strides=(1, 1), padding=((1, 1), (1, 1)),
        dimension_numbers=("NHWC", "HWIO", "NHWC"))
    y = y * scale[None, None, None, :] + bias[None, None, None, :]
    return jnp.maximum(y, 0.0)


def _ref_forward(x_nchw, params):
    x = jnp.transpose(x_nchw, (0, 2, 3, 1))
    s1, b1 = fold_bn(params["b1"], params["gamma1"], params["beta1"],
                     params["mean1"], params["var1"])
    s2, b2 = fold_bn(params["b2"], params["gamma2"], params["beta2"],
                     params["mean2"], params["var2"])
    h = _ref_block(x, params["w1"], s1, b1)
    y = _ref_block(h, params["w2"], s2, b2)
    return jnp.transpose(y, (0, 3, 1, 2))


def init_params(key, in_channels, out_channels, mid_channels=None):
    if mid_channels is None:
        mid_channels = out_channels
    k = jax.random.split(key, 8)
    dt = jnp.float32
    return {
        # Conv weights stored directly in HWIO.
        "w1": 0.1 * jax.random.normal(k[0], (3, 3, in_channels, mid_channels), dt),
        "b1": 0.05 * jax.random.normal(k[1], (mid_channels,), dt),
        "gamma1": 1.0 + 0.1 * jax.random.normal(k[2], (mid_channels,), dt),
        "beta1": 0.1 * jax.random.normal(k[3], (mid_channels,), dt),
        "mean1": jnp.zeros((mid_channels,), dt),   # BN running stats (fresh init)
        "var1": jnp.ones((mid_channels,), dt),
        "w2": 0.1 * jax.random.normal(k[4], (3, 3, mid_channels, out_channels), dt),
        "b2": 0.05 * jax.random.normal(k[5], (out_channels,), dt),
        "gamma2": 1.0 + 0.1 * jax.random.normal(k[6], (out_channels,), dt),
        "beta2": 0.1 * jax.random.normal(k[7], (out_channels,), dt),
        "mean2": jnp.zeros((out_channels,), dt),
        "var2": jnp.ones((out_channels,), dt),
    }


if __name__ == "__main__":
    key = jax.random.PRNGKey(0)
    kx, kp = jax.random.split(key)

    N, Cin, H, W = 2, 4, 16, 16
    Cout = 8

    x = jax.random.normal(kx, (N, Cin, H, W), jnp.float32)   # NCHW, like PyTorch
    params = init_params(kp, Cin, Cout)

    out = jax.block_until_ready(double_conv_dropout(x, params))
    assert out.shape == (N, Cout, H, W), out.shape

    ref = _ref_forward(x, params)
    err = float(jnp.max(jnp.abs(out - ref)))
    assert err < 1e-3, err

    print("KERNEL_OK")
</pallas_src>

<mosaic_0001>
module attributes {stable_mosaic.version = 11 : i64} {
  func.func @_double_conv_kernel(%arg0: i32, %arg1: memref<1x16x64xf32, #tpu.memory_space<vmem>>, %arg2: memref<3x64x128xf32, #tpu.memory_space<vmem>>, %arg3: memref<1x128xf32, #tpu.memory_space<vmem>>, %arg4: memref<1x128xf32, #tpu.memory_space<vmem>>, %arg5: memref<3x128x128xf32, #tpu.memory_space<vmem>>, %arg6: memref<1x128xf32, #tpu.memory_space<vmem>>, %arg7: memref<1x128xf32, #tpu.memory_space<vmem>>, %arg8: memref<1x16x128xf32, #tpu.memory_space<vmem>>, %arg9: memref<18x64xf32, #tpu.memory_space<vmem>>, %arg10: memref<18x128xf32, #tpu.memory_space<vmem>>) attributes {dimension_semantics = [#tpu.dimension_semantics<parallel>], iteration_bounds = array<i64: 2>, scalar_prefetch = 0 : i64, scratch_operands = 2 : i64, tpu.core_type = #tpu.core_type<tc>, window_params = [{transform_indices = @transform_0, window_bounds = array<i64: 1, 16, 64>}, {pipeline_mode = #tpu.pipeline_mode<synchronous>, transform_indices = @transform_1, window_bounds = array<i64: 3, 64, 128>}, {pipeline_mode = #tpu.pipeline_mode<synchronous>, transform_indices = @transform_2, window_bounds = array<i64: 1, 128>}, {pipeline_mode = #tpu.pipeline_mode<synchronous>, transform_indices = @transform_3, window_bounds = array<i64: 1, 128>}, {pipeline_mode = #tpu.pipeline_mode<synchronous>, transform_indices = @transform_4, window_bounds = array<i64: 3, 128, 128>}, {pipeline_mode = #tpu.pipeline_mode<synchronous>, transform_indices = @transform_5, window_bounds = array<i64: 1, 128>}, {pipeline_mode = #tpu.pipeline_mode<synchronous>, transform_indices = @transform_6, window_bounds = array<i64: 1, 128>}, {transform_indices = @transform_7, window_bounds = array<i64: 1, 16, 128>}]} {
    %cst = arith.constant 0.000000e+00 : f32
    %0 = vector.broadcast %cst : f32 to vector<1x64xf32>
    %c0 = arith.constant 0 : index
    %c0_0 = arith.constant 0 : index
    %1 = vector.load %arg9[%c0, %c0_0] : memref<18x64xf32, #tpu.memory_space<vmem>>, vector<1x64xf32>
    tpu.vector_store %arg9[%c0, %c0_0], %0 {strides = array<i32>} : memref<18x64xf32, #tpu.memory_space<vmem>>, vector<1x64xf32>,
    %cst_1 = arith.constant 0.000000e+00 : f32
    %2 = vector.broadcast %cst_1 : f32 to vector<1x64xf32>
    %c17 = arith.constant 17 : index
    %c0_2 = arith.constant 0 : index
    %3 = vector.load %arg9[%c17, %c0_2] : memref<18x64xf32, #tpu.memory_space<vmem>>, vector<1x64xf32>
    tpu.vector_store %arg9[%c17, %c0_2], %2 {strides = array<i32>} : memref<18x64xf32, #tpu.memory_space<vmem>>, vector<1x64xf32>,
    %c0_3 = arith.constant 0 : index
    %c0_4 = arith.constant 0 : index
    %c0_5 = arith.constant 0 : index
    %4 = vector.load %arg1[%c0_3, %c0_4, %c0_5] : memref<1x16x64xf32, #tpu.memory_space<vmem>>, vector<1x16x64xf32>
    %5 = vector.shape_cast %4 : vector<1x16x64xf32> to vector<16x64xf32>
    %c1 = arith.constant 1 : index
    %c0_6 = arith.constant 0 : index
    %6 = vector.load %arg9[%c1, %c0_6] : memref<18x64xf32, #tpu.memory_space<vmem>>, vector<16x64xf32>
    tpu.vector_store %arg9[%c1, %c0_6], %5 {strides = array<i32>} : memref<18x64xf32, #tpu.memory_space<vmem>>, vector<16x64xf32>,
    %c0_7 = arith.constant 0 : index
    %c0_8 = arith.constant 0 : index
    %7 = vector.load %arg9[%c0_7, %c0_8] : memref<18x64xf32, #tpu.memory_space<vmem>>, vector<16x64xf32>
    %c0_9 = arith.constant 0 : index
    %c0_10 = arith.constant 0 : index
    %c0_11 = arith.constant 0 : index
    %8 = vector.load %arg2[%c0_9, %c0_10, %c0_11] : memref<3x64x128xf32, #tpu.memory_space<vmem>>, vector<1x64x128xf32>
    %9 = vector.shape_cast %8 : vector<1x64x128xf32> to vector<64x128xf32>
    %cst_12 = arith.constant dense<0.000000e+00> : vector<16x128xf32>
    %10 = tpu.matmul %7, %9, %cst_12 {dimension_numbers = #tpu.dot_dimension_numbers<[1], [0], [0], [1], [0, 0, 1, 1], [], []>} : vector<16x64xf32>, vector<64x128xf32>, vector<16x128xf32> -> vector<16x128xf32>
    %c1_13 = arith.constant 1 : index
    %c0_14 = arith.constant 0 : index
    %11 = vector.load %arg9[%c1_13, %c0_14] : memref<18x64xf32, #tpu.memory_space<vmem>>, vector<16x64xf32>
    %c1_15 = arith.constant 1 : index
    %c0_16 = arith.constant 0 : index
    %c0_17 = arith.constant 0 : index
    %12 = vector.load %arg2[%c1_15, %c0_16, %c0_17] : memref<3x64x128xf32, #tpu.memory_space<vmem>>, vector<1x64x128xf32>
    %13 = vector.shape_cast %12 : vector<1x64x128xf32> to vector<64x128xf32>
    %cst_18 = arith.constant dense<0.000000e+00> : vector<16x128xf32>
    %14 = tpu.matmul %11, %13, %cst_18 {dimension_numbers = #tpu.dot_dimension_numbers<[1], [0], [0], [1], [0, 0, 1, 1], [], []>} : vector<16x64xf32>, vector<64x128xf32>, vector<16x128xf32> -> vector<16x128xf32>
    %15 = arith.addf %10, %14 : vector<16x128xf32>
    %c2 = arith.constant 2 : index
    %c0_19 = arith.constant 0 : index
    %16 = vector.load %arg9[%c2, %c0_19] : memref<18x64xf32, #tpu.memory_space<vmem>>, vector<16x64xf32>
    %c2_20 = arith.constant 2 : index
    %c0_21 = arith.constant 0 : index
    %c0_22 = arith.constant 0 : index
    %17 = vector.load %arg2[%c2_20, %c0_21, %c0_22] : memref<3x64x128xf32, #tpu.memory_space<vmem>>, vector<1x64x128xf32>
    %18 = vector.shape_cast %17 : vector<1x64x128xf32> to vector<64x128xf32>
    %cst_23 = arith.constant dense<0.000000e+00> : vector<16x128xf32>
    %19 = tpu.matmul %16, %18, %cst_23 {dimension_numbers = #tpu.dot_dimension_numbers<[1], [0], [0], [1], [0, 0, 1, 1], [], []>} : vector<16x64xf32>, vector<64x128xf32>, vector<16x128xf32> -> vector<16x128xf32>
    %20 = arith.addf %15, %19 : vector<16x128xf32>
    %c0_24 = arith.constant 0 : index
    %c0_25 = arith.constant 0 : index
    %21 = vector.load %arg3[%c0_24, %c0_25] : memref<1x128xf32, #tpu.memory_space<vmem>>, vector<1x128xf32>
    %22 = vector.broadcast %21 : vector<1x128xf32> to vector<16x128xf32>
    %23 = arith.mulf %20, %22 : vector<16x128xf32>
    %c0_26 = arith.constant 0 : index
    %c0_27 = arith.constant 0 : index
    %24 = vector.load %arg4[%c0_26, %c0_27] : memref<1x128xf32, #tpu.memory_space<vmem>>, vector<1x128xf32>
    %25 = vector.broadcast %24 : vector<1x128xf32> to vector<16x128xf32>
    %26 = arith.addf %23, %25 : vector<16x128xf32>
    %cst_28 = arith.constant 0.000000e+00 : f32
    %27 = vector.broadcast %cst_28 : f32 to vector<16x128xf32>
    %28 = arith.maximumf %26, %27 : vector<16x128xf32>
    %cst_29 = arith.constant 0.000000e+00 : f32
    %29 = vector.broadcast %cst_29 : f32 to vector<1x128xf32>
    %c0_30 = arith.constant 0 : index
    %c0_31 = arith.constant 0 : index
    %30 = vector.load %arg10[%c0_30, %c0_31] : memref<18x128xf32, #tpu.memory_space<vmem>>, vector<1x128xf32>
    tpu.vector_store %arg10[%c0_30, %c0_31], %29 {strides = array<i32>} : memref<18x128xf32, #tpu.memory_space<vmem>>, vector<1x128xf32>,
    %cst_32 = arith.constant 0.000000e+00 : f32
    %31 = vector.broadcast %cst_32 : f32 to vector<1x128xf32>
    %c17_33 = arith.constant 17 : index
    %c0_34 = arith.constant 0 : index
    %32 = vector.load %arg10[%c17_33, %c0_34] : memref<18x128xf32, #tpu.memory_space<vmem>>, vector<1x128xf32>
    tpu.vector_store %arg10[%c17_33, %c0_34], %31 {strides = array<i32>} : memref<18x128xf32, #tpu.memory_space<vmem>>, vector<1x128xf32>,
    %c1_35 = arith.constant 1 : index
    %c0_36 = arith.constant 0 : index
    %33 = vector.load %arg10[%c1_35, %c0_36] : memref<18x128xf32, #tpu.memory_space<vmem>>, vector<16x128xf32>
    tpu.vector_store %arg10[%c1_35, %c0_36], %28 {strides = array<i32>} : memref<18x128xf32, #tpu.memory_space<vmem>>, vector<16x128xf32>,
    %c0_37 = arith.constant 0 : index
    %c0_38 = arith.constant 0 : index
    %34 = vector.load %arg10[%c0_37, %c0_38] : memref<18x128xf32, #tpu.memory_space<vmem>>, vector<16x128xf32>
    %c0_39 = arith.constant 0 : index
    %c0_40 = arith.constant 0 : index
    %c0_41 = arith.constant 0 : index
    %35 = vector.load %arg5[%c0_39, %c0_40, %c0_41] : memref<3x128x128xf32, #tpu.memory_space<vmem>>, vector<1x128x128xf32>
    %36 = vector.shape_cast %35 : vector<1x128x128xf32> to vector<128x128xf32>
    %cst_42 = arith.constant dense<0.000000e+00> : vector<16x128xf32>
    %37 = tpu.matmul %34, %36, %cst_42 {dimension_numbers = #tpu.dot_dimension_numbers<[1], [0], [0], [1], [0, 0, 1, 1], [], []>} : vector<16x128xf32>, vector<128x128xf32>, vector<16x128xf32> -> vector<16x128xf32>
    %c1_43 = arith.constant 1 : index
    %c0_44 = arith.constant 0 : index
    %38 = vector.load %arg10[%c1_43, %c0_44] : memref<18x128xf32, #tpu.memory_space<vmem>>, vector<16x128xf32>
    %c1_45 = arith.constant 1 : index
    %c0_46 = arith.constant 0 : index
    %c0_47 = arith.constant 0 : index
    %39 = vector.load %arg5[%c1_45, %c0_46, %c0_47] : memref<3x128x128xf32, #tpu.memory_space<vmem>>, vector<1x128x128xf32>
    %40 = vector.shape_cast %39 : vector<1x128x128xf32> to vector<128x128xf32>
    %cst_48 = arith.constant dense<0.000000e+00> : vector<16x128xf32>
    %41 = tpu.matmul %38, %40, %cst_48 {dimension_numbers = #tpu.dot_dimension_numbers<[1], [0], [0], [1], [0, 0, 1, 1], [], []>} : vector<16x128xf32>, vector<128x128xf32>, vector<16x128xf32> -> vector<16x128xf32>
    %42 = arith.addf %37, %41 : vector<16x128xf32>
    %c2_49 = arith.constant 2 : index
    %c0_50 = arith.constant 0 : index
    %43 = vector.load %arg10[%c2_49, %c0_50] : memref<18x128xf32, #tpu.memory_space<vmem>>, vector<16x128xf32>
    %c2_51 = arith.constant 2 : index
    %c0_52 = arith.constant 0 : index
    %c0_53 = arith.constant 0 : index
    %44 = vector.load %arg5[%c2_51, %c0_52, %c0_53] : memref<3x128x128xf32, #tpu.memory_space<vmem>>, vector<1x128x128xf32>
    %45 = vector.shape_cast %44 : vector<1x128x128xf32> to vector<128x128xf32>
    %cst_54 = arith.constant dense<0.000000e+00> : vector<16x128xf32>
    %46 = tpu.matmul %43, %45, %cst_54 {dimension_numbers = #tpu.dot_dimension_numbers<[1], [0], [0], [1], [0, 0, 1, 1], [], []>} : vector<16x128xf32>, vector<128x128xf32>, vector<16x128xf32> -> vector<16x128xf32>
    %47 = arith.addf %42, %46 : vector<16x128xf32>
    %c0_55 = arith.constant 0 : index
    %c0_56 = arith.constant 0 : index
    %48 = vector.load %arg6[%c0_55, %c0_56] : memref<1x128xf32, #tpu.memory_space<vmem>>, vector<1x128xf32>
    %49 = vector.broadcast %48 : vector<1x128xf32> to vector<16x128xf32>
    %50 = arith.mulf %47, %49 : vector<16x128xf32>
    %c0_57 = arith.constant 0 : index
    %c0_58 = arith.constant 0 : index
    %51 = vector.load %arg7[%c0_57, %c0_58] : memref<1x128xf32, #tpu.memory_space<vmem>>, vector<1x128xf32>
    %52 = vector.broadcast %51 : vector<1x128xf32> to vector<16x128xf32>
    %53 = arith.addf %50, %52 : vector<16x128xf32>
    %cst_59 = arith.constant 0.000000e+00 : f32
    %54 = vector.broadcast %cst_59 : f32 to vector<16x128xf32>
    %55 = arith.maximumf %53, %54 : vector<16x128xf32>
    %c0_60 = arith.constant 0 : index
    %c0_61 = arith.constant 0 : index
    %c0_62 = arith.constant 0 : index
    %56 = vector.load %arg8[%c0_60, %c0_61, %c0_62] : memref<1x16x128xf32, #tpu.memory_space<vmem>>, vector<1x16x128xf32>
    %57 = vector.shape_cast %56 : vector<1x16x128xf32> to vector<16x128xf32>
    %58 = vector.shape_cast %55 : vector<16x128xf32> to vector<1x16x128xf32>
    tpu.vector_store %arg8[%c0_60, %c0_61, %c0_62], %58 {strides = array<i32>} : memref<1x16x128xf32, #tpu.memory_space<vmem>>, vector<1x16x128xf32>,
    return
  }
  func.func @transform_0(%arg0: i32) -> (i32, i32, i32) {
    %c0_i32 = arith.constant 0 : i32
    %c0_i32_0 = arith.constant 0 : i32
    %c0_i32_1 = arith.constant 0 : i32
    return %arg0, %c0_i32, %c0_i32_0 : i32, i32, i32
  }
  func.func @transform_1(%arg0: i32) -> (i32, i32, i32) {
    %c0_i32 = arith.constant 0 : i32
    %c0_i32_0 = arith.constant 0 : i32
    %c0_i32_1 = arith.constant 0 : i32
    %c0_i32_2 = arith.constant 0 : i32
    return %c0_i32, %c0_i32_0, %c0_i32_1 : i32, i32, i32
  }
  func.func @transform_2(%arg0: i32) -> (i32, i32) {
    %c0_i32 = arith.constant 0 : i32
    %c0_i32_0 = arith.constant 0 : i32
    %c0_i32_1 = arith.constant 0 : i32
    return %c0_i32, %c0_i32_0 : i32, i32
  }
  func.func @transform_3(%arg0: i32) -> (i32, i32) {
    %c0_i32 = arith.constant 0 : i32
    %c0_i32_0 = arith.constant 0 : i32
    %c0_i32_1 = arith.constant 0 : i32
    return %c0_i32, %c0_i32_0 : i32, i32
  }
  func.func @transform_4(%arg0: i32) -> (i32, i32, i32) {
    %c0_i32 = arith.constant 0 : i32
    %c0_i32_0 = arith.constant 0 : i32
    %c0_i32_1 = arith.constant 0 : i32
    %c0_i32_2 = arith.constant 0 : i32
    return %c0_i32, %c0_i32_0, %c0_i32_1 : i32, i32, i32
  }
  func.func @transform_5(%arg0: i32) -> (i32, i32) {
    %c0_i32 = arith.constant 0 : i32
    %c0_i32_0 = arith.constant 0 : i32
    %c0_i32_1 = arith.constant 0 : i32
    return %c0_i32, %c0_i32_0 : i32, i32
  }
  func.func @transform_6(%arg0: i32) -> (i32, i32) {
    %c0_i32 = arith.constant 0 : i32
    %c0_i32_0 = arith.constant 0 : i32
    %c0_i32_1 = arith.constant 0 : i32
    return %c0_i32, %c0_i32_0 : i32, i32
  }
  func.func @transform_7(%arg0: i32) -> (i32, i32, i32) {
    %c0_i32 = arith.constant 0 : i32
    %c0_i32_0 = arith.constant 0 : i32
    %c0_i32_1 = arith.constant 0 : i32
    return %arg0, %c0_i32, %c0_i32_0 : i32, i32, i32
  }
}

</mosaic_0001>

<bundles_post_ra>
// kernel: tile.23
= control target key start
LH: loop header
LB: loop body
LE: loop exit
PB: predicated region body
PF: predicated region fallthrough
CT: control target
= control target key end

     0   :  { %s28_s0 = inlined_call_operand.vmem [shape: f32[8], index: 0, kind: input, shape index: {}]   ;;  %s29_s1 = inlined_call_operand.vmem [shape: f32[16,8], index: 1, kind: output, shape index: {}]  }
   0x1   :  { %v4_v0 = vld [vmem:[%s28_s0] ss:$0 sm:$0xff] }
   0x2   :  { %5 = vst [vmem:[%s29_s1] sm:$0xff] %v4_v0  ;;  %8 = vst [vmem:[%s29_s1 + $0x8] sm:$0xff] %v4_v0 }

// kernel: tile.24
= control target key start
LH: loop header
LB: loop body
LE: loop exit
PB: predicated region body
PF: predicated region fallthrough
CT: control target
= control target key end

     0   :  { %s133_s10 = smov 120   ;;  %s134_s11 = smov 104   ;;  %vm3_vm0 = vcmask 64512   ;;  %vm9_vm1 = vcmask 1048512   ;;  %vm15_vm2 = vcmask 982912   ;;  %vm21_vm3 = vcmask 917312   ;;  %s209_s0 = inlined_call_operand.vmem [shape: f32[16,8], index: 0, kind: input, shape index: {}]   ;;  %s210_s1 = inlined_call_operand.vmem [shape: f32[1,128], index: 1, kind: output, shape index: {}]  }
   0x1   :  { %v103_v0 = vld [vmem:[%s209_s0 + $0xf] sm:$0x1]   ;;  %v105_v1 = vld [vmem:[%s209_s0 + $0xd] sm:$0x1]   ;;  %v104_v2 = vld [vmem:[%s209_s0 + $0xe] sm:$0x1]  }
   0x2   :  { %7 = vrot.lane.b32.xlu0 %v103_v0, %s133_s10  ;;  %19 = vrot.lane.b32.xlu1 %v105_v1, %s134_s11  ;;  %v106_v3 = vld [vmem:[%s209_s0 + $0xc] sm:$0x1]   ;;  %s135_s16 = smov 112   ;;  %s136_s17 = smov 96   ;;  %v107_v4 = vld [vmem:[%s209_s0 + $0xb] sm:$0x1]  }
   0x3   :  { %v108_v5 = vld [vmem:[%s209_s0 + $0xa] sm:$0x1]   ;;  %v2_v6 = vld [vmem:[%s209_s0] sm:$0x1]   ;;  %s137_s24 = smov 88   ;;  %s138_s25 = smov 80  }
   0x4   :  { %4 = vst.msk [vmem:[#allocation0] sm:$0x1] %vm3_vm0, %v2_v6   ;;  %v109_v7 = vld [vmem:[%s209_s0 + $0x9] sm:$0x1]   ;;  %v110_v8 = vld [vmem:[%s209_s0 + $0x8] sm:$0x1]  }
   0x5   :  { %s139_s30 = smov 72   ;;  %s140_s2 = smov 64   ;;  %v111_v9 = vld [vmem:[%s209_s0 + $0x7] sm:$0x1]   ;;  %v112_v10 = vld [vmem:[%s209_s0 + $0x6] sm:$0x1]  }
   0x6   :  { %13 = vrot.lane.b32.xlu0 %v104_v2, %s135_s16  ;;  %25 = vrot.lane.b32.xlu1 %v106_v3, %s136_s17  ;;  %s141_s7 = smov 56   ;;  %s142_s8 = smov 48   ;;  %v113_v11 = vld [vmem:[%s209_s0 + $0x5] sm:$0x1]   ;;  %v114_v12 = vld [vmem:[%s209_s0 + $0x4] sm:$0x1]  }
   0x7   :  { %s143_s13 = smov 40   ;;  %s144_s14 = smov 32   ;;  %v115_v13 = vld [vmem:[%s209_s0 + $0x3] sm:$0x1]   ;;  %v116_v14 = vld [vmem:[%s209_s0 + $0x2] sm:$0x1]  }
   0x8   :  { %s145_s19 = smov 24   ;;  %s146_s20 = smov 16   ;;  %v117_v15 = vld [vmem:[%s209_s0 + $0x1] sm:$0x1]   ;;  %vm27_vm4 = vcmask 851712   ;;  %vm33_vm5 = vcmask 786112  }
   0x9   :  { %s147_s0 = smov 8   ;;  %vm39_vm6 = vcmask 720512   ;;  %vm45_vm7 = vcmask 654912   ;;  %vm51_vm8 = vcmask 589312   ;;  %vm57_vm9 = vcmask 523712  }
   0xa   :  { %31 = vrot.lane.b32.xlu0 %v107_v4, %s137_s24  ;;  %37 = vrot.lane.b32.xlu1 %v108_v5, %s138_s25  ;;  %vm63_vm10 = vcmask 458112   ;;  %vm69_vm11 = vcmask 392512   ;;  %vm75_vm12 = vcmask 326912   ;;  %vm81_vm13 = vcmask 261312  }
   0xb   :  { %vm87_vm14 = vcmask 195712   ;;  %vm93_vm15 = vcmask 130112  }
   0xe   :  { %43 = vrot.lane.b32.xlu0 %v109_v7, %s139_s30  ;;  %49 = vrot.lane.b32.xlu1 %v110_v8, %s140_s2 }
  0x12   :  { %55 = vrot.lane.b32.xlu0 %v111_v9, %s141_s7  ;;  %61 = vrot.lane.b32.xlu1 %v112_v10, %s142_s8 }
  0x16   :  { %67 = vrot.lane.b32.xlu0 %v113_v11, %s143_s13  ;;  %73 = vrot.lane.b32.xlu1 %v114_v12, %s144_s14 }
  0x1a   :  { %79 = vrot.lane.b32.xlu0 %v115_v13, %s145_s19  ;;  %85 = vrot.lane.b32.xlu1 %v116_v14, %s146_s20 }
  0x1e   :  { %91 = vrot.lane.b32.xlu0 %v117_v15, %s147_s0 }
  0x74   :  { %v8_v16 = vpop.permute.xlu0 %7   ;;  %v20_v17 = vpop.permute.xlu1 %19  }
  0x75   :  { %10 = vst.msk [vmem:[#allocation0] sm:$0x1] %vm9_vm1, %v8_v16  }
  0x78   :  { %v14_v18 = vpop.permute.xlu0 %13   ;;  %v26_v19 = vpop.permute.xlu1 %25  }
  0x79   :  { %16 = vst.msk [vmem:[#allocation0] sm:$0x1] %vm15_vm2, %v14_v18  }
  0x7a   :  { %22 = vst.msk [vmem:[#allocation0] sm:$0x1] %vm21_vm3, %v20_v17  }
  0x7b   :  { %28 = vst.msk [vmem:[#allocation0] sm:$0x1] %vm27_vm4, %v26_v19  }
  0x7c   :  { %v32_v20 = vpop.permute.xlu0 %31   ;;  %v38_v21 = vpop.permute.xlu1 %37  }
  0x7d   :  { %34 = vst.msk [vmem:[#allocation0] sm:$0x1] %vm33_vm5, %v32_v20  }
  0x7e   :  { %40 = vst.msk [vmem:[#allocation0] sm:$0x1] %vm39_vm6, %v38_v21  }
  0x80   :  { %v44_v22 = vpop.permute.xlu0 %43   ;;  %v50_v23 = vpop.permute.xlu1 %49  }
  0x81   :  { %46 = vst.msk [vmem:[#allocation0] sm:$0x1] %vm45_vm7, %v44_v22  }
  0x82   :  { %52 = vst.msk [vmem:[#allocation0] sm:$0x1] %vm51_vm8, %v50_v23  }
  0x84   :  { %v56_v24 = vpop.permute.xlu0 %55   ;;  %v62_v25 = vpop.permute.xlu1 %61  }
  0x85   :  { %58 = vst.msk [vmem:[#allocation0] sm:$0x1] %vm57_vm9, %v56_v24  }
  0x86   :  { %64 = vst.msk [vmem:[#allocation0] sm:$0x1] %vm63_vm10, %v62_v25  }
  0x88   :  { %v68_v26 = vpop.permute.xlu0 %67   ;;  %v74_v27 = vpop.permute.xlu1 %73  }
  0x89   :  { %70 = vst.msk [vmem:[#allocation0] sm:$0x1] %vm69_vm11, %v68_v26  }
  0x8a   :  { %76 = vst.msk [vmem:[#allocation0] sm:$0x1] %vm75_vm12, %v74_v27  }
  0x8c   :  { %v80_v28 = vpop.permute.xlu0 %79   ;;  %v86_v29 = vpop.permute.xlu1 %85  }
  0x8d   :  { %82 = vst.msk [vmem:[#allocation0] sm:$0x1] %vm81_vm13, %v80_v28  }
  0x8e   :  { %88 = vst.msk [vmem:[#allocation0] sm:$0x1] %vm87_vm14, %v86_v29  }
  0x90   :  { %v92_v30 = vpop.permute.xlu0 %91  }
  0x91   :  { %94 = vst.msk [vmem:[#allocation0] sm:$0x1] %vm93_vm15, %v92_v30  }
  0x98   :  { %v99_v31 = vld [vmem:[#allocation0] sm:$0x1] }
  0x99   :  { %102 = vst [vmem:[%s210_s1] sm:$0x1] %v99_v31 }

// kernel: double_conv_dropout.1
= control target key start
LH: loop header
LB: loop body
LE: loop exit
PB: predicated region body
PF: predicated region fallthrough
CT: control target
= control target key end

     0   :  { %s1323_s24 = smov 0   ;;  %s1583_s0 = inlined_call_operand.vmem [shape: f32[2,16,64], index: 0, kind: input, shape index: {}]   ;;  %s1584_s1 = inlined_call_operand.vmem [shape: f32[3,64,128], index: 1, kind: input, shape index: {}]   ;;  %s1585_s2 = inlined_call_operand.vmem [shape: f32[1,128], index: 2, kind: input, shape index: {}]   ;;  %s1586_s3 = inlined_call_operand.vmem [shape: f32[1,128], index: 3, kind: input, shape index: {}]   ;;  %s1587_s4 = inlined_call_operand.vmem [shape: f32[3,128,128], index: 4, kind: input, shape index: {}]   ;;  %s1588_s5 = inlined_call_operand.vmem [shape: f32[1,128], index: 5, kind: input, shape index: {}]   ;;  %s1589_s6 = inlined_call_operand.vmem [shape: f32[1,128], index: 6, kind: input, shape index: {}]   ;;  %s1590_s7 = inlined_call_operand.vmem [shape: f32[2,16,128], index: 7, kind: output, shape index: {}]  }
   0x1 LB: > { %s948_s25 = sadd.s32 4294967295, %s1280_s24   ;;  %p952_p0 = scmp.ge.s32.totalorder %s1280_s24, 1  ;;  %s1280_s24 = sphi %s1323_s24, %s17_s24  }
   0x2   : > { %p237_p1 = scmp.lt.s32.totalorder %s1280_s24, 3 }
   0x4   : > { %p238_p2 = pnand %p952_p0, %p237_p1 }
   0x5   : > { %p269_p3 = scmp.lt.s32.totalorder (!%p238_p2), %s948_s25, 1 }
   0x6   : > { %241 = sbr.rel (%p238_p2) target bundleno = 487 (0x1e7), region = 48 }
   0xb   : > { %v964_v0 = vld [vmem:[%s1584_s1 + $0x78] sm:$0xff]  ;;  %v963_v2 = vld [vmem:[%s1584_s1 + $0x70] sm:$0xff]  ;;  %vm279_vm0 = vcmask 516096   ;;  %v962_v4 = vld [vmem:[%s1584_s1 + $0x68] sm:$0xff]  ;;  %s1592_s25 = smov (!%p269_p3, %s948_s25), 1  ;;  %v1282_v6 = vmov 0.0  }
   0xc   : > { %v296_v1 = vld [vmem:[%s1584_s1 + $0x38] sm:$0xff]  ;;  %1103 = vmatprep.subr.mxu0 %v964_v0  ;;  %v295_v3 = vld [vmem:[%s1584_s1 + $0x30] sm:$0xff]  ;;  %v294_v5 = vld [vmem:[%s1584_s1 + $0x28] sm:$0xff]  ;;  %280 = vst.msk [vmem:[#allocation2] sm:$0x1] %vm279_vm0, %v1282_v6  ;;  %s1017_s19 = sshll.u32 %s1592_s25, 4 }
   0xd   : > { %1122 = vmatprep.subr.mxu1 %v296_v1  ;;  %1104 = vmatpush3.msra.mxu0 %v964_v0  ;;  %281 = vst.msk [vmem:[#allocation2 + $0x11] sm:$0x1] %vm279_vm0, %v1282_v6  ;;  %584 = vst [vmem:[#allocation3] sm:$0x1] %v1282_v6  ;;  %v961_v7 = vld [vmem:[%s1584_s1 + $0x60] sm:$0xff]  ;;  %vm284_vm1 = vcmask 523264   ;;  %s273_s26 = scalar_lea.vmem %s1583_s0, %s1017_s19  ;;  %s278_s21 = scalar_lea.vmem %s1590_s7, %s1017_s19 }
   0xe   : > { %1123 = vmatpush3.msra.mxu1 %v296_v1  ;;  %585 = vst [vmem:[#allocation3 + $0x11] sm:$0x1] %v1282_v6  ;;  %1105 = vmatprep.subr.mxu0 %v963_v2  ;;  %v293_v8 = vld [vmem:[%s1584_s1 + $0x20] sm:$0xff]  ;;  %v960_v9 = vld [vmem:[%s1584_s1 + $0x58] sm:$0xff]  ;;  %v283_v12 = vld [vmem:[%s273_s26 + $0x8] sm:$0xff] }
   0xf   : > { %1124 = vmatprep.subr.mxu1 %v295_v3  ;;  %1106 = vmatpush3.msra.mxu0 %v963_v2  ;;  %v292_v10 = vld [vmem:[%s1584_s1 + $0x18] sm:$0xff]  ;;  %v282_v11 = vld [vmem:[%s273_s26] sm:$0xff]  ;;  %286 = vst.msk [vmem:[#allocation2 + $0x9] sm:$0xff] %vm284_vm1, %v283_v12  ;;  %v959_v13 = vld [vmem:[%s1584_s1 + $0x50] sm:$0xff] }
  0x10   : > { %1125 = vmatpush3.msra.mxu1 %v295_v3  ;;  %1107 = vmatprep.subr.mxu0 %v962_v4  ;;  %285 = vst.msk [vmem:[#allocation2 + $0x1] sm:$0xff] %vm284_vm1, %v282_v11  ;;  %v291_v14 = vld [vmem:[%s1584_s1 + $0x10] sm:$0xff]  ;;  %v958_v15 = vld [vmem:[%s1584_s1 + $0x48] sm:$0xff]  ;;  %v957_v17 = vld [vmem:[%s1584_s1 + $0x40] sm:$0xff] }
  0x11   : > { %1126 = vmatprep.subr.mxu1 %v294_v5  ;;  %1108 = vmatpush3.msra.mxu0 %v962_v4  ;;  %v290_v16 = vld [vmem:[%s1584_s1 + $0x8] sm:$0xff]  ;;  %v289_v18 = vld [vmem:[%s1584_s1] sm:$0xff]  ;;  %v976_v23 = vld [vmem:[%s1584_s1 + $0xb8] sm:$0xff] }
  0x12   : > { %1127 = vmatpush3.msra.mxu1 %v294_v5  ;;  %1109 = vmatprep.subr.mxu0 %v961_v7  ;;  %v975_v25 = vld [vmem:[%s1584_s1 + $0xb0] sm:$0xff]  ;;  %v974_v26 = vld [vmem:[%s1584_s1 + $0xa8] sm:$0xff]  ;;  %v973_v27 = vld [vmem:[%s1584_s1 + $0xa0] sm:$0xff] }
  0x13   : > { %1128 = vmatprep.subr.mxu1 %v293_v8  ;;  %1110 = vmatpush3.msra.mxu0 %v961_v7  ;;  %v972_v28 = vld [vmem:[%s1584_s1 + $0x98] sm:$0xff]  ;;  %v971_v29 = vld [vmem:[%s1584_s1 + $0x90] sm:$0xff]  ;;  %v970_v30 = vld [vmem:[%s1584_s1 + $0x88] sm:$0xff] }
  0x14   : > { %1129 = vmatpush3.msra.mxu1 %v293_v8  ;;  %1111 = vmatprep.subr.mxu0 %v960_v9  ;;  %v969_v31 = vld [vmem:[%s1584_s1 + $0x80] sm:$0xff]  ;;  %v996_v33 = vld [vmem:[%s1587_s4 + $0xf8] sm:$0xff]  ;;  %v995_v34 = vld [vmem:[%s1587_s4 + $0xf0] sm:$0xff] }
  0x15   : > { %1130 = vmatprep.subr.mxu1 %v292_v10  ;;  %1112 = vmatpush3.msra.mxu0 %v960_v9  ;;  %v994_v35 = vld [vmem:[%s1587_s4 + $0xe8] sm:$0xff]  ;;  %v993_v36 = vld [vmem:[%s1587_s4 + $0xe0] sm:$0xff]  ;;  %v605_v37 = vld [vmem:[%s1587_s4 + $0x78] sm:$0xff] }
  0x16   : > { %1131 = vmatpush3.msra.mxu1 %v292_v10  ;;  %1113 = vmatprep.subr.mxu0 %v959_v13  ;;  %v298_v21 = vld [vmem:[#allocation2 + $0x9] sm:$0xff]  ;;  %v992_v39 = vld [vmem:[%s1587_s4 + $0xd8] sm:$0xff]  ;;  %v602_v43 = vld [vmem:[%s1587_s4 + $0x60] sm:$0xff] }
  0x17   : > { %1132 = vmatprep.subr.mxu1 %v291_v14  ;;  %1114 = vmatpush3.msra.mxu0 %v959_v13  ;;  %v297_v19 = vld [vmem:[#allocation2 + $0x1] sm:$0xff]  ;;  %v471_v32 = vld [vmem:[#allocation2 + $0xa] sm:$0xff]  ;;  %v601_v44 = vld [vmem:[%s1587_s4 + $0x58] sm:$0xff] }
  0x18   : > { %1133 = vmatpush3.msra.mxu1 %v291_v14  ;;  %1115 = vmatprep.subr.mxu0 %v958_v15  ;;  %v287_v20 = vld [vmem:[#allocation2] sm:$0xff]  ;;  %v288_v22 = vld [vmem:[#allocation2 + $0x8] sm:$0xff]  ;;  %v604_v38 = vld [vmem:[%s1587_s4 + $0x70] sm:$0xff] }
  0x19   : > { %1134 = vmatprep.subr.mxu1 %v290_v16  ;;  %1116 = vmatpush3.msra.mxu0 %v958_v15  ;;  %v470_v24 = vld [vmem:[#allocation2 + $0x2] sm:$0xff]  ;;  %v991_v41 = vld [vmem:[%s1587_s4 + $0xd0] sm:$0xff]  ;;  %v988_v47 = vld [vmem:[%s1587_s4 + $0xb8] sm:$0xff] }
  0x1a   : > { %1135 = vmatpush3.msra.mxu1 %v290_v16  ;;  %1117 = vmatprep.subr.mxu0 %v957_v17  ;;  %v603_v40 = vld [vmem:[%s1587_s4 + $0x68] sm:$0xff]  ;;  %v989_v45 = vld [vmem:[%s1587_s4 + $0xc0] sm:$0xff]  ;;  %v600_v46 = vld [vmem:[%s1587_s4 + $0x50] sm:$0xff] }
  0x1b   : > { %1136 = vmatprep.subr.mxu1 %v289_v18  ;;  %1118 = vmatpush3.msra.mxu0 %v957_v17  ;;  %v990_v42 = vld [vmem:[%s1587_s4 + $0xc8] sm:$0xff]  ;;  %v987_v48 = vld [vmem:[%s1587_s4 + $0xb0] sm:$0xff]  ;;  %v985_v51 = vld [vmem:[%s1587_s4 + $0xa0] sm:$0xff] }
  0x1c   : > { %1119 = vmatprep.mubr.msk.f32.mxu0 %vm284_vm1, %v297_v19  ;;  %1137 = vmatpush3.msra.mxu1 %v289_v18  ;;  %v986_v49 = vld [vmem:[%s1587_s4 + $0xa8] sm:$0xff]  ;;  %v598_v52 = vld [vmem:[%s1587_s4 + $0x40] sm:$0xff]  ;;  %v984_v53 = vld [vmem:[%s1587_s4 + $0x98] sm:$0xff] }
  0x1d   : > { %1138 = vmatprep.mubr.msk.f32.mxu1 %vm284_vm1, %v287_v20  ;;  %1120 = vmatmul.mubr.msk.f32.vlgmr.msra.gmra.mxu0 %vm284_vm1, %v298_v21  ;;  %v599_v50 = vld [vmem:[%s1587_s4 + $0x48] sm:$0xff]  ;;  %v597_v54 = vld [vmem:[%s1587_s4 + $0x38] sm:$0xff]  ;;  %v983_v55 = vld [vmem:[%s1587_s4 + $0x90] sm:$0xff] }
  0x1e   : > { %1139 = vmatmul.mubr.msk.f32.vlgmr.msra.gmra.mxu1 %vm284_vm1, %v288_v22  ;;  %1141 = vmatprep.subr.mxu0 %v976_v23  ;;  %v596_v56 = vld [vmem:[%s1587_s4 + $0x30] sm:$0xff]  ;;  %v982_v57 = vld [vmem:[%s1587_s4 + $0x88] sm:$0xff]  ;;  %v981_v59 = vld [vmem:[%s1587_s4 + $0x80] sm:$0xff] }
  0x1f   : > { %1157 = vmatprep.mubr.msk.f32.mxu0 %vm284_vm1, %v470_v24  ;;  %1142 = vmatpush3.msra.mxu0 %v976_v23  ;;  %v595_v58 = vld [vmem:[%s1587_s4 + $0x28] sm:$0xff]  ;;  %v594_v60 = vld [vmem:[%s1587_s4 + $0x20] sm:$0xff]  ;;  %v1012_v61 = vld [vmem:[%s1587_s4 + $0x178] sm:$0xff] }
  0x20   : > { %1143 = vmatprep.subr.mxu0 %v975_v25  ;;  %1160 = vmatprep.subr.mxu1 %v996_v33  ;;  %v593_v62 = vld [vmem:[%s1587_s4 + $0x18] sm:$0xff]  ;;  %v592_v63 = vld [vmem:[%s1587_s4 + $0x10] sm:$0xff]  ;;  %v591_v0 = vld [vmem:[%s1587_s4 + $0x8] sm:$0xff] }
  0x21   : > { %1144 = vmatpush3.msra.mxu0 %v975_v25  ;;  %1161 = vmatpush3.msra.mxu1 %v996_v33  ;;  %v590_v1 = vld [vmem:[%s1587_s4] sm:$0xff]  ;;  %v1011_v20 = vld [vmem:[%s1587_s4 + $0x170] sm:$0xff]  ;;  %v1010_v21 = vld [vmem:[%s1587_s4 + $0x168] sm:$0xff] }
  0x22   : > { %1145 = vmatprep.subr.mxu0 %v974_v26  ;;  %1162 = vmatprep.subr.mxu1 %v995_v34  ;;  %v979_v8 = vld [vmem:[%s1585_s2] ss:$0 sm:$0xff]  ;;  %v1008_v23 = vld [vmem:[%s1587_s4 + $0x158] sm:$0xff] }
  0x23   : > { %1146 = vmatpush3.msra.mxu0 %v974_v26  ;;  %1163 = vmatpush3.msra.mxu1 %v995_v34  ;;  %v980_v11 = vld [vmem:[%s1586_s3] ss:$0 sm:$0xff]  ;;  %v1000_v34 = vld [vmem:[%s1587_s4 + $0x118] sm:$0xff] }
  0x24   : > { %1147 = vmatprep.subr.mxu0 %v973_v27  ;;  %1164 = vmatprep.subr.mxu1 %v994_v35  ;;  %v1009_v22 = vld [vmem:[%s1587_s4 + $0x160] sm:$0xff] }
  0x25   : > { %1148 = vmatpush3.msra.mxu0 %v973_v27  ;;  %1165 = vmatpush3.msra.mxu1 %v994_v35  ;;  %v1007_v27 = vld [vmem:[%s1587_s4 + $0x150] sm:$0xff]  ;;  %v1001_v33 = vld [vmem:[%s1587_s4 + $0x120] sm:$0xff] }
  0x26   : > { %1149 = vmatprep.subr.mxu0 %v972_v28  ;;  %1166 = vmatprep.subr.mxu1 %v993_v36  ;;  %v999_v35 = vld [vmem:[%s1587_s4 + $0x110] sm:$0xff] }
  0x27   : > { %1150 = vmatpush3.msra.mxu0 %v972_v28  ;;  %1167 = vmatpush3.msra.mxu1 %v993_v36  ;;  %v1006_v28 = vld [vmem:[%s1587_s4 + $0x148] sm:$0xff] }
  0x28   : > { %1151 = vmatprep.subr.mxu0 %v971_v29  ;;  %1168 = vmatprep.subr.mxu1 %v992_v39  ;;  %v998_v36 = vld [vmem:[%s1587_s4 + $0x108] sm:$0xff] }
  0x29   : > { %1152 = vmatpush3.msra.mxu0 %v971_v29  ;;  %1169 = vmatpush3.msra.mxu1 %v992_v39  ;;  %v1005_v29 = vld [vmem:[%s1587_s4 + $0x140] sm:$0xff] }
  0x2a   : > { %1153 = vmatprep.subr.mxu0 %v970_v30  ;;  %1170 = vmatprep.subr.mxu1 %v991_v41 }
  0x2b   : > { %1154 = vmatpush3.msra.mxu0 %v970_v30  ;;  %1171 = vmatpush3.msra.mxu1 %v991_v41  ;;  %v1004_v30 = vld [vmem:[%s1587_s4 + $0x138] sm:$0xff] }
  0x2c   : > { %1155 = vmatprep.subr.mxu0 %v969_v31  ;;  %1172 = vmatprep.subr.mxu1 %v990_v42 }
  0x2d   : > { %1156 = vmatpush3.msra.mxu0 %v969_v31  ;;  %1173 = vmatpush3.msra.mxu1 %v990_v42  ;;  %v1003_v31 = vld [vmem:[%s1587_s4 + $0x130] sm:$0xff] }
  0x2e   : > { %1158 = vmatmul.mubr.msk.f32.vlgmr.msra.gmra.mxu0 %vm284_vm1, %v471_v32  ;;  %1195 = vmatprep.subr.mxu0 %v605_v37  ;;  %v1002_v32 = vld [vmem:[%s1587_s4 + $0x128] sm:$0xff] }
  0x2f   : > { %1196 = vmatpush3.msra.mxu0 %v605_v37  ;;  %1174 = vmatprep.subr.mxu1 %v989_v45  ;;  %v997_v37 = vld [vmem:[%s1587_s4 + $0x100] sm:$0xff] }
  0x30   : > { %1197 = vmatprep.subr.mxu0 %v604_v38  ;;  %1175 = vmatpush3.msra.mxu1 %v989_v45  ;;  %v1013_v45 = vld [vmem:[%s1588_s5] ss:$0 sm:$0xff] }
  0x31   : > { %1198 = vmatpush3.msra.mxu0 %v604_v38  ;;  %1176 = vmatprep.subr.mxu1 %v988_v47 }
  0x32   : > { %1199 = vmatprep.subr.mxu0 %v603_v40  ;;  %1177 = vmatpush3.msra.mxu1 %v988_v47 }
  0x33   : > { %1200 = vmatpush3.msra.mxu0 %v603_v40  ;;  %1178 = vmatprep.subr.mxu1 %v987_v48 }
  0x34   : > { %1201 = vmatprep.subr.mxu0 %v602_v43  ;;  %1179 = vmatpush3.msra.mxu1 %v987_v48  ;;  %v1014_v48 = vld [vmem:[%s1589_s6] ss:$0 sm:$0xff] }
  0x35   : > { %1202 = vmatpush3.msra.mxu0 %v602_v43  ;;  %1180 = vmatprep.subr.mxu1 %v986_v49 }
  0x36   : > { %1203 = vmatprep.subr.mxu0 %v601_v44  ;;  %1181 = vmatpush3.msra.mxu1 %v986_v49 }
  0x37   : > { %1204 = vmatpush3.msra.mxu0 %v601_v44  ;;  %1182 = vmatprep.subr.mxu1 %v985_v51 }
  0x38   : > { %1205 = vmatprep.subr.mxu0 %v600_v46  ;;  %1183 = vmatpush3.msra.mxu1 %v985_v51 }
  0x39   : > { %1206 = vmatpush3.msra.mxu0 %v600_v46  ;;  %1184 = vmatprep.subr.mxu1 %v984_v53 }
  0x3a   : > { %1207 = vmatprep.subr.mxu0 %v599_v50  ;;  %1185 = vmatpush3.msra.mxu1 %v984_v53 }
  0x3b   : > { %1208 = vmatpush3.msra.mxu0 %v599_v50  ;;  %1186 = vmatprep.subr.mxu1 %v983_v55 }
  0x3c   : > { %1209 = vmatprep.subr.mxu0 %v598_v52  ;;  %1187 = vmatpush3.msra.mxu1 %v983_v55 }
  0x3d   : > { %1210 = vmatpush3.msra.mxu0 %v598_v52  ;;  %1188 = vmatprep.subr.mxu1 %v982_v57 }
  0x3e   : > { %1211 = vmatprep.subr.mxu0 %v597_v54  ;;  %1189 = vmatpush3.msra.mxu1 %v982_v57 }
  0x3f   : > { %1212 = vmatpush3.msra.mxu0 %v597_v54  ;;  %1190 = vmatprep.subr.mxu1 %v981_v59 }
  0x40   : > { %1213 = vmatprep.subr.mxu0 %v596_v56  ;;  %1191 = vmatpush3.msra.mxu1 %v981_v59 }
  0x41   : > { %1214 = vmatpush3.msra.mxu0 %v596_v56  ;;  %1230 = vmatprep.subr.mxu1 %v1012_v61 }
  0x42   : > { %1215 = vmatprep.subr.mxu0 %v595_v58 }
  0x43   : > { %1216 = vmatpush3.msra.mxu0 %v595_v58 }
  0x44   : > { %1217 = vmatprep.subr.mxu0 %v594_v60 }
  0x45   : > { %1218 = vmatpush3.msra.mxu0 %v594_v60 }
  0x46   : > { %1219 = vmatprep.subr.mxu0 %v593_v62 }
  0x47   : > { %1220 = vmatpush3.msra.mxu0 %v593_v62 }
  0x48   : > { %1221 = vmatprep.subr.mxu0 %v592_v63 }
  0x49   : > { %1222 = vmatpush3.msra.mxu0 %v592_v63 }
  0x4a   : > { %1223 = vmatprep.subr.mxu0 %v591_v0 }
  0x4b   : > { %1224 = vmatpush3.msra.mxu0 %v591_v0 }
  0x4c   : > { %1225 = vmatprep.subr.mxu0 %v590_v1 }
  0x4d   : > { %1226 = vmatpush3.msra.mxu0 %v590_v1 }
  0xdd   : > { %v1121_v2 = vpop.f32.mrf.mxu0 }
  0xde   : > { %v1140_v3 = vpop.f32.mrf.mxu1 }
  0xdf   : > { %v380_v4 = vpop.f32.mrf.mxu0  ;;  %v467_v6 = vadd.f32 %v1140_v3, %v1121_v2 }
  0xe0   : > { %v461_v5 = vpop.f32.mrf.mxu1 }
  0xe1   : > { %v462_v9 = vadd.f32 %v461_v5, %v380_v4 }
  0xee   : > { %v1159_v7 = vpop.f32.mrf.mxu0 }
  0xef   : > { %v563_v10 = vadd.f32 %v1159_v7, %v467_v6 }
  0xf0   : > { %v553_v12 = vpop.f32.mrf.mxu0 }
  0xf1   : > { %v572_v13 = vmul.f32 %v979_v8, %v563_v10  ;;  %v562_v14 = vadd.f32 %v553_v12, %v462_v9 }
  0xf3   : > { %v581_v15 = vadd.f32 %v980_v11, %v572_v13  ;;  %v571_v16 = vmul.f32 %v979_v8, %v562_v14 }
  0xf5   : > { %v583_v17 = vmax.f32 %v581_v15, 0.0  ;;  %v580_v18 = vadd.f32 %v980_v11, %v571_v16 }
  0xf7   : > { %587 = vst [vmem:[#allocation3 + $0x9] sm:$0xff] %v583_v17  ;;  %v582_v19 = vmax.f32 %v580_v18, 0.0 }
  0xf9   : > { %586 = vst [vmem:[#allocation3 + $0x1] sm:$0xff] %v582_v19  ;;  %1192 = vmatprep.mubr.f32.mxu1 %v582_v19 }
  0xfa   : > { %1193 = vmatmul.mubr.f32.vlgmr.msra.gmra.mxu1 %v583_v17 }
  0xfb   : > { %1231 = vmatpush3.msra.mxu1 %v1012_v61 }
  0xfc   : > { %1232 = vmatprep.subr.mxu1 %v1011_v20 }
  0xfd   : > { %1233 = vmatpush3.msra.mxu1 %v1011_v20 }
  0xfe   : > { %1234 = vmatprep.subr.mxu1 %v1010_v21  ;;  %v776_v38 = vld [vmem:[#allocation3 + $0xa] sm:$0xff] }
  0xff   : > { %1235 = vmatpush3.msra.mxu1 %v1010_v21 }
 0x100   : > { %v588_v24 = vld [vmem:[#allocation3] sm:$0xff]  ;;  %v589_v25 = vld [vmem:[#allocation3 + $0x8] sm:$0xff]  ;;  %1236 = vmatprep.subr.mxu1 %v1009_v22 }
 0x101   : > { %v775_v26 = vld [vmem:[#allocation3 + $0x2] sm:$0xff]  ;;  %1227 = vmatprep.mubr.f32.mxu0 %v588_v24  ;;  %1237 = vmatpush3.msra.mxu1 %v1009_v22 }
 0x102   : > { %1262 = vmatprep.mubr.f32.mxu1 %v775_v26  ;;  %1228 = vmatmul.mubr.f32.vlgmr.msra.gmra.mxu0 %v589_v25 }
 0x103   : > { %1238 = vmatprep.subr.mxu1 %v1008_v23 }
 0x104   : > { %1239 = vmatpush3.msra.mxu1 %v1008_v23 }
 0x105   : > { %1240 = vmatprep.subr.mxu1 %v1007_v27 }
 0x106   : > { %1241 = vmatpush3.msra.mxu1 %v1007_v27 }
 0x107   : > { %1242 = vmatprep.subr.mxu1 %v1006_v28 }
 0x108   : > { %1243 = vmatpush3.msra.mxu1 %v1006_v28 }
 0x109   : > { %1244 = vmatprep.subr.mxu1 %v1005_v29 }
 0x10a   : > { %1245 = vmatpush3.msra.mxu1 %v1005_v29 }
 0x10b   : > { %1246 = vmatprep.subr.mxu1 %v1004_v30 }
 0x10c   : > { %1247 = vmatpush3.msra.mxu1 %v1004_v30 }
 0x10d   : > { %1248 = vmatprep.subr.mxu1 %v1003_v31 }
 0x10e   : > { %1249 = vmatpush3.msra.mxu1 %v1003_v31 }
 0x10f   : > { %1250 = vmatprep.subr.mxu1 %v1002_v32 }
 0x110   : > { %1251 = vmatpush3.msra.mxu1 %v1002_v32 }
 0x111   : > { %1252 = vmatprep.subr.mxu1 %v1001_v33 }
 0x112   : > { %1253 = vmatpush3.msra.mxu1 %v1001_v33 }
 0x113   : > { %1254 = vmatprep.subr.mxu1 %v1000_v34 }
 0x114   : > { %1255 = vmatpush3.msra.mxu1 %v1000_v34 }
 0x115   : > { %1256 = vmatprep.subr.mxu1 %v999_v35 }
 0x116   : > { %1257 = vmatpush3.msra.mxu1 %v999_v35 }
 0x117   : > { %1258 = vmatprep.subr.mxu1 %v998_v36 }
 0x118   : > { %1259 = vmatpush3.msra.mxu1 %v998_v36 }
 0x119   : > { %1260 = vmatprep.subr.mxu1 %v997_v37 }
 0x11a   : > { %1261 = vmatpush3.msra.mxu1 %v997_v37 }
 0x11b   : > { %1263 = vmatmul.mubr.f32.vlgmr.msra.gmra.mxu1 %v776_v38 }
 0x1ba   : > { %v1194_v39 = vpop.f32.mrf.mxu1 }
 0x1bc   : > { %v691_v41 = vpop.f32.mrf.mxu1 }
 0x1c2   : > { %v1229_v40 = vpop.f32.mrf.mxu0 }
 0x1c3   : > { %v772_v43 = vadd.f32 %v1229_v40, %v1194_v39 }
 0x1c4   : > { %v766_v42 = vpop.f32.mrf.mxu0 }
 0x1c5   : > { %v767_v46 = vadd.f32 %v766_v42, %v691_v41 }
 0x1db   : > { %v1264_v44 = vpop.f32.mrf.mxu1 }
 0x1dc   : > { %v870_v47 = vadd.f32 %v1264_v44, %v772_v43 }
 0x1dd   : > { %v860_v49 = vpop.f32.mrf.mxu1 }
 0x1de   : > { %v879_v50 = vmul.f32 %v1013_v45, %v870_v47  ;;  %v869_v51 = vadd.f32 %v860_v49, %v767_v46 }
 0x1e0   : > { %v888_v52 = vadd.f32 %v1014_v48, %v879_v50  ;;  %v878_v53 = vmul.f32 %v1013_v45, %v869_v51 }
 0x1e2   : > { %v890_v54 = vmax.f32 %v888_v52, 0.0  ;;  %v887_v55 = vadd.f32 %v1014_v48, %v878_v53 }
 0x1e4   : > { %892 = vst [vmem:[%s278_s21 + $0x8] sm:$0xff] %v890_v54  ;;  %v889_v56 = vmax.f32 %v887_v55, 0.0 }
 0x1e6   : > { %891 = vst [vmem:[%s278_s21] sm:$0xff] %v889_v56 }
 0x1e7 PF: > { %s17_s24 = sadd.s32 1, %s1280_s24  }
 0x1e8   : > { %p14_p4 = scmp.ge.s32.totalorder %s17_s24, 4  }
 0x1ea   :  { %16 = sbr.rel (!%p14_p4) target bundleno = 1 (0x1), region = 82 }

</bundles_post_ra>
